<compile_context>
chip_gen: v7x
topology: tpu7x:2x2x1
jax: 0.10.0
libtpu: 0.0.40
codegen_flags: <defaults>
</compile_context>

<pallas_src>
import jax
import jax.numpy as jnp
from jax import lax
from jax.experimental import pallas as pl
from jax.experimental.pallas import tpu as pltpu


def _swd_kernel(xy_ref, proj_ref, o_ref):
    """One grid step: Bt batch elements, all projections, x & y together.

    xy_ref:   (Bt, 2N, D)    -- x rows stacked on top of y rows per batch elem
    proj_ref: (Bt, P, D)     -- unit projection directions
    o_ref:    (1, 1, 2*Bt*P) -- per-(batch, projection) sum_n (sorted diff)^2
                                (first Bt*P lanes = x-y, rest duplicate y-x)
    """
    Bt, twoN, _ = xy_ref.shape
    N = twoN // 2
    P = proj_ref.shape[1]
    H = Bt * P                     # number of (batch, projection) pairs
    R = 2 * H                      # lane width: x columns then y columns

    # ---- Projection: one fused MXU matmul per batch element covers x and y.
    # Columns of `t` are ordered [x(b=0),...,x(b=Bt-1), y(b=0),...,y(b=Bt-1)],
    # each group P wide, so column c pairs with column c + H.
    dn = (((1,), (1,)), ((), ()))                    # contract the D axis
    cols_x, cols_y = [], []
    for b in range(Bt):                              # static unroll, Bt tiny
        tb = lax.dot_general(xy_ref[b], proj_ref[b], dn,
                             preferred_element_type=jnp.float32)   # [2N, P]
        cols_x.append(tb[:N, :])
        cols_y.append(tb[N:, :])
    t = jnp.concatenate(cols_x + cols_y, axis=1)     # [N, R], lane-dense

    # ---- Rank sort of every column (lane) along the point axis (sublanes).
    # Each [N, R] slab of the [N, N, R] intermediates is a dense (8, 128)
    # vreg: comparisons are pure VPU work, reductions are sublane-axis sums.
    ti = jnp.broadcast_to(t[:, None, :], (N, N, R))  # value at point i
    tj = jnp.broadcast_to(t[None, :, :], (N, N, R))  # value at point j
    i_idx = lax.broadcasted_iota(jnp.int32, (N, N, R), 0)
    j_idx = lax.broadcasted_iota(jnp.int32, (N, N, R), 1)
    less = jnp.logical_or(tj < ti, jnp.logical_and(tj == ti, j_idx < i_idx))
    # rank[i, r] = #elements strictly before t[i, r] in column r (permutation).
    rank = jnp.sum(less.astype(jnp.int32), axis=1)   # [N, R]

    # sorted[k, r] = sum_i t[i, r] * (rank[i, r] == k); reuse i_idx as the
    # output-position iota (same axis-0 iota) so the machinery is built once.
    sel = (rank[None, :, :] == i_idx).astype(jnp.float32)          # [K, I, R]
    t_sorted = jnp.sum(sel * t[None, :, :], axis=1)                # [N, R]

    # ---- Pair sorted x with sorted y via a half-rotation of the lane axis
    # (column c + H holds the y partner of column c); keeps the store a full
    # 128-lane unmasked write.
    d = t_sorted - pltpu.roll(t_sorted, shift=H, axis=1)           # [N, R]
    o_ref[...] = jnp.sum(d * d, axis=0, keepdims=True)[None, :, :]  # (1,1,R)
    # TODO(synk): for large N, chunk the [N, N, R] comparison tensor or switch
    # to a bitonic network; the rank sort is O(N^2) in flops and VMEM.


def _pick_block_batch(B):
    """Largest divisor of B that is <= 8 (bounds lane width / VMEM per step)."""
    for cand in range(min(B, 8), 0, -1):
        if B % cand == 0:
            return cand
    return 1


def swd_loss(x, y, *, num_projs, key):
    """Pallas equivalent of SWD(num_projs).forward(x, y) -> {'loss': scalar}."""
    B, N, D = x.shape
    P = num_projs

    # Deterministic random unit projections (torch.randn + L2 normalize, dim=2).
    proj = jax.random.normal(key, (B, P, D), dtype=jnp.float32)
    proj = proj / jnp.sqrt(jnp.sum(proj * proj, axis=2, keepdims=True))

    bt = _pick_block_batch(B)          # batch elements packed per grid step
    C = B // bt                        # grid size
    R = 2 * bt * P                     # lane width inside the kernel

    # Fuse x and y into one input so a single matmul per batch element
    # projects both point clouds.
    xy = jnp.concatenate(
        [x.astype(jnp.float32), y.astype(jnp.float32)], axis=1)   # [B, 2N, D]

    out = pl.pallas_call(
        _swd_kernel,
        out_shape=jax.ShapeDtypeStruct((C, 1, R), jnp.float32),
        grid_spec=pltpu.PrefetchScalarGridSpec(
            num_scalar_prefetch=0,
            grid=(C,),
            in_specs=[
                pl.BlockSpec((bt, 2 * N, D), lambda c: (c, 0, 0)),
                pl.BlockSpec((bt, P, D), lambda c: (c, 0, 0)),
            ],
            out_specs=pl.BlockSpec((1, 1, R), lambda c: (c, 0, 0)),
        ),
        compiler_params=pltpu.CompilerParams(
            dimension_semantics=("parallel",)),
    )(xy, proj)

    # First bt*P lanes of each chunk hold sum_n (sorted_x - sorted_y)^2 per
    # (batch-in-chunk, projection); finish mean / sqrt / *N on the host side.
    # TODO(synk): p_type='circular' (torch.cdist) and degree != 2 paths are not
    # implemented; the module's defaults (linear, degree=2) are.
    s = out[:, 0, : bt * P].reshape(B, P)              # [B, P]
    msq = jnp.mean(s, axis=1) / jnp.float32(N)         # mean over p and n
    first_moment = jnp.sqrt(msq)                       # [B]
    loss = jnp.float32(N) * jnp.mean(first_moment)     # x.shape[1] * mean_B
    return {"loss": loss}


def _swd_ref(x, y, proj):
    """Pure-JAX reference mirroring the PyTorch code (same projections)."""
    N = x.shape[1]
    xproj = jnp.einsum("bnd,bpd->bpn", x, proj)
    yproj = jnp.einsum("bnd,bpd->bpn", y, proj)
    diff = jnp.sort(xproj, axis=-1) - jnp.sort(yproj, axis=-1)
    msq = jnp.mean(jnp.abs(diff) ** 2.0, axis=2)               # [B, P]
    first_moment = jnp.sqrt(jnp.mean(msq, axis=1))             # [B]
    return N * jnp.mean(first_moment)


if __name__ == "__main__":
    B, N, D, P = 2, 8, 3, 32
    key = jax.random.PRNGKey(0)
    kx, ky, kp = jax.random.split(key, 3)

    x = jax.random.normal(kx, (B, N, D), dtype=jnp.float32)
    y = jax.random.normal(ky, (B, N, D), dtype=jnp.float32)

    result = swd_loss(x, y, num_projs=P, key=kp)
    loss = jax.block_until_ready(result["loss"])

    # Correctness check against pure-JAX reference with identical projections.
    proj = jax.random.normal(kp, (B, P, D), dtype=jnp.float32)
    proj = proj / jnp.sqrt(jnp.sum(proj * proj, axis=2, keepdims=True))
    ref = jax.block_until_ready(_swd_ref(x, y, proj))

    assert abs(float(loss) - float(ref)) < 1e-4, (float(loss), float(ref))
    print("KERNEL_OK")
</pallas_src>

<mosaic_0001>
module attributes {stable_mosaic.version = 11 : i64} {
  func.func @_swd_kernel(%arg0: i32, %arg1: memref<2x16x3xf32, #tpu.memory_space<vmem>>, %arg2: memref<2x32x3xf32, #tpu.memory_space<vmem>>, %arg3: memref<1x1x128xf32, #tpu.memory_space<vmem>>) attributes {dimension_semantics = [#tpu.dimension_semantics<parallel>], iteration_bounds = array<i64: 1>, scalar_prefetch = 0 : i64, scratch_operands = 0 : i64, tpu.core_type = #tpu.core_type<tc>, window_params = [{transform_indices = @transform_0, window_bounds = array<i64: 2, 16, 3>}, {transform_indices = @transform_1, window_bounds = array<i64: 2, 32, 3>}, {transform_indices = @transform_2, window_bounds = array<i64: 1, 1, 128>}]} {
    %c0 = arith.constant 0 : index
    %c0_0 = arith.constant 0 : index
    %c0_1 = arith.constant 0 : index
    %0 = vector.load %arg1[%c0, %c0_0, %c0_1] : memref<2x16x3xf32, #tpu.memory_space<vmem>>, vector<1x16x3xf32>
    %1 = vector.shape_cast %0 : vector<1x16x3xf32> to vector<16x3xf32>
    %c0_2 = arith.constant 0 : index
    %c0_3 = arith.constant 0 : index
    %c0_4 = arith.constant 0 : index
    %2 = vector.load %arg2[%c0_2, %c0_3, %c0_4] : memref<2x32x3xf32, #tpu.memory_space<vmem>>, vector<1x32x3xf32>
    %3 = vector.shape_cast %2 : vector<1x32x3xf32> to vector<32x3xf32>
    %cst = arith.constant dense<0.000000e+00> : vector<16x32xf32>
    %4 = tpu.matmul %1, %3, %cst {dimension_numbers = #tpu.dot_dimension_numbers<[1], [1], [0], [0], [0, 0, 1, 0], [], []>} : vector<16x3xf32>, vector<32x3xf32>, vector<16x32xf32> -> vector<16x32xf32>
    %5 = vector.extract_strided_slice %4 {offsets = [0, 0], sizes = [8, 32], strides = [1, 1]} : vector<16x32xf32> to vector<8x32xf32>
    %6 = vector.extract_strided_slice %4 {offsets = [8, 0], sizes = [8, 32], strides = [1, 1]} : vector<16x32xf32> to vector<8x32xf32>
    %c1 = arith.constant 1 : index
    %c0_5 = arith.constant 0 : index
    %c0_6 = arith.constant 0 : index
    %7 = vector.load %arg1[%c1, %c0_5, %c0_6] : memref<2x16x3xf32, #tpu.memory_space<vmem>>, vector<1x16x3xf32>
    %8 = vector.shape_cast %7 : vector<1x16x3xf32> to vector<16x3xf32>
    %c1_7 = arith.constant 1 : index
    %c0_8 = arith.constant 0 : index
    %c0_9 = arith.constant 0 : index
    %9 = vector.load %arg2[%c1_7, %c0_8, %c0_9] : memref<2x32x3xf32, #tpu.memory_space<vmem>>, vector<1x32x3xf32>
    %10 = vector.shape_cast %9 : vector<1x32x3xf32> to vector<32x3xf32>
    %cst_10 = arith.constant dense<0.000000e+00> : vector<16x32xf32>
    %11 = tpu.matmul %8, %10, %cst_10 {dimension_numbers = #tpu.dot_dimension_numbers<[1], [1], [0], [0], [0, 0, 1, 0], [], []>} : vector<16x3xf32>, vector<32x3xf32>, vector<16x32xf32> -> vector<16x32xf32>
    %12 = vector.extract_strided_slice %11 {offsets = [0, 0], sizes = [8, 32], strides = [1, 1]} : vector<16x32xf32> to vector<8x32xf32>
    %13 = vector.extract_strided_slice %11 {offsets = [8, 0], sizes = [8, 32], strides = [1, 1]} : vector<16x32xf32> to vector<8x32xf32>
    %14 = tpu.concatenate %5, %12, %6, %13 in 1 : vector<8x32xf32>, vector<8x32xf32>, vector<8x32xf32>, vector<8x32xf32> -> vector<8x128xf32>
    %15 = vector.shape_cast %14 : vector<8x128xf32> to vector<8x1x128xf32>
    %16 = vector.shape_cast %15 : vector<8x1x128xf32> to vector<8x1x128xf32>
    %17 = vector.broadcast %16 : vector<8x1x128xf32> to vector<8x8x128xf32>
    %18 = vector.shape_cast %14 : vector<8x128xf32> to vector<1x8x128xf32>
    %19 = vector.shape_cast %18 : vector<1x8x128xf32> to vector<1x8x128xf32>
    %20 = vector.broadcast %19 : vector<1x8x128xf32> to vector<8x8x128xf32>
    %21 = tpu.iota {dimensions = array<i32: 0>} : vector<8x8x128xi32>
    %22 = tpu.iota {dimensions = array<i32: 1>} : vector<8x8x128xi32>
    %23 = arith.cmpf olt, %20, %17 : vector<8x8x128xf32>
    %24 = arith.cmpf oeq, %20, %17 : vector<8x8x128xf32>
    %25 = arith.cmpi slt, %22, %21 : vector<8x8x128xi32>
    %26 = arith.andi %24, %25 : vector<8x8x128xi1>
    %27 = arith.ori %23, %26 : vector<8x8x128xi1>
    %28 = arith.extui %27 : vector<8x8x128xi1> to vector<8x8x128xi32>
    %cst_11 = arith.constant dense<0> : vector<8x128xi32>
    %29 = vector.multi_reduction <add>, %28, %cst_11 [1] : vector<8x8x128xi32> to vector<8x128xi32>
    %30 = vector.shape_cast %29 : vector<8x128xi32> to vector<1x8x128xi32>
    %31 = vector.broadcast %30 : vector<1x8x128xi32> to vector<8x8x128xi32>
    %32 = arith.cmpi eq, %31, %21 : vector<8x8x128xi32>
    %33 = arith.extui %32 : vector<8x8x128xi1> to vector<8x8x128xi32>
    %34 = arith.sitofp %33 : vector<8x8x128xi32> to vector<8x8x128xf32>
    %35 = vector.shape_cast %14 : vector<8x128xf32> to vector<1x8x128xf32>
    %36 = vector.broadcast %35 : vector<1x8x128xf32> to vector<8x8x128xf32>
    %37 = arith.mulf %34, %36 : vector<8x8x128xf32>
    %cst_12 = arith.constant dense<0.000000e+00> : vector<8x128xf32>
    %38 = vector.multi_reduction <add>, %37, %cst_12 [1] : vector<8x8x128xf32> to vector<8x128xf32>
    %c64_i32 = arith.constant 64 : i32
    %39 = tpu.dynamic_rotate %38 by %c64_i32 dim 1 : vector<8x128xf32>, i32 -> vector<8x128xf32>
    %40 = arith.subf %38, %39 : vector<8x128xf32>
    %41 = arith.mulf %40, %40 : vector<8x128xf32>
    %cst_13 = arith.constant dense<0.000000e+00> : vector<128xf32>
    %42 = vector.multi_reduction <add>, %41, %cst_13 [0] : vector<8x128xf32> to vector<128xf32>
    %43 = vector.shape_cast %42 : vector<128xf32> to vector<1x128xf32>
    %44 = vector.shape_cast %43 : vector<1x128xf32> to vector<1x1x128xf32>
    %c0_14 = arith.constant 0 : index
    %c0_15 = arith.constant 0 : index
    %c0_16 = arith.constant 0 : index
    %45 = vector.load %arg3[%c0_14, %c0_15, %c0_16] : memref<1x1x128xf32, #tpu.memory_space<vmem>>, vector<1x1x128xf32>
    tpu.vector_store %arg3[%c0_14, %c0_15, %c0_16], %44 {strides = array<i32>} : memref<1x1x128xf32, #tpu.memory_space<vmem>>, vector<1x1x128xf32>,
    return
  }
  func.func @transform_0(%arg0: i32) -> (i32, i32, i32) {
    %c0_i32 = arith.constant 0 : i32
    %c0_i32_0 = arith.constant 0 : i32
    %c0_i32_1 = arith.constant 0 : i32
    return %arg0, %c0_i32, %c0_i32_0 : i32, i32, i32
  }
  func.func @transform_1(%arg0: i32) -> (i32, i32, i32) {
    %c0_i32 = arith.constant 0 : i32
    %c0_i32_0 = arith.constant 0 : i32
    %c0_i32_1 = arith.constant 0 : i32
    return %arg0, %c0_i32, %c0_i32_0 : i32, i32, i32
  }
  func.func @transform_2(%arg0: i32) -> (i32, i32, i32) {
    %c0_i32 = arith.constant 0 : i32
    %c0_i32_0 = arith.constant 0 : i32
    %c0_i32_1 = arith.constant 0 : i32
    return %arg0, %c0_i32, %c0_i32_0 : i32, i32, i32
  }
}

</mosaic_0001>

<bundles_post_ra>
// kernel: tpu_custom_call.1
= control target key start
LH: loop header
LB: loop body
LE: loop exit
PB: predicated region body
PF: predicated region fallthrough
CT: control target
= control target key end

     0   :  { %vm18_vm0 = vcmask 23552   ;;  %s2195_s0 = inlined_call_operand.vmem [shape: f32[2,16,3], index: 0, kind: input, shape index: {}]   ;;  %s2196_s1 = inlined_call_operand.vmem [shape: f32[2,32,3], index: 1, kind: input, shape index: {}]   ;;  %s2197_s2 = inlined_call_operand.hbm [shape: f32[1,1,128], index: 2, kind: output, shape index: {}]  }
   0x1   :  { %v1038_v0 = vld [vmem:[%s2196_s1 + $0x20] sm:$0xff]  ;;  %v1039_v1 = vld [vmem:[%s2196_s1 + $0x28] sm:$0xff]  ;;  %vm1234_vm1 = vmpackc.low %vm18_vm0, %vm18_vm0 }
   0x2   :  { %v14_v2 = vld [vmem:[%s2196_s1] sm:$0xff]  ;;  %v1158_v4 = vpack.c.bf16 %v1039_v1, %v1038_v0  ;;  %v15_v5 = vld [vmem:[%s2196_s1 + $0x8] sm:$0xff]  ;;  %v1040_v6 = vld [vmem:[%s2196_s1 + $0x30] sm:$0xff] }
   0x3   :  { %v1146_v7 = vpack.c.bf16 %v15_v5, %v14_v2  ;;  %v1041_v8 = vld [vmem:[%s2196_s1 + $0x38] sm:$0xff]  ;;  %v16_v9 = vld [vmem:[%s2196_s1 + $0x10] sm:$0xff]  ;;  %v12_v14 = vld [vmem:[%s2195_s0] sm:$0xff] }
   0x4   :  { %v17_v10 = vld [vmem:[%s2196_s1 + $0x18] sm:$0xff]  ;;  %1160 = vmatprep.subr.msk.bf16.mxu1 %vm1234_vm1, %v1158_v4  ;;  %v1164_v11 = vpack.c.bf16 %v1041_v8, %v1040_v6  ;;  %v1036_v13 = vld [vmem:[%s2195_s0 + $0x10] sm:$0xff] }
   0x5   :  { %v1152_v12 = vpack.c.bf16 %v17_v10, %v16_v9  ;;  %1163 = vmatpush3.bf16.xpose.msk.msra.mxu1 %vm1234_vm1, %v1158_v4  ;;  %1148 = vmatprep.subr.msk.bf16.mxu0 %vm1234_vm1, %v1146_v7 }
   0x6   :  { %7 = vsyncpa [#allocation3], 0  ;;  %1151 = vmatpush3.bf16.xpose.msk.msra.mxu0 %vm1234_vm1, %v1146_v7  ;;  %1166 = vmatprep.subr.msk.bf16.mxu1 %vm1234_vm1, %v1164_v11  ;;  %v1037_v15 = vld [vmem:[%s2195_s0 + $0x18] sm:$0xff]  ;;  %v13_v16 = vld [vmem:[%s2195_s0 + $0x8] sm:$0xff]  ;;  %s1201_s4 = smov 96   ;;  %s1202_s5 = smov 32   ;;  %v236_v23 = vlaneseq }
   0x7   :  { %1154 = vmatprep.subr.msk.bf16.mxu0 %vm1234_vm1, %v1152_v12  ;;  %1143 = vmatprep.mubr.msk.f32.mxu1 %vm18_vm0, %v1036_v13  ;;  %s1203_s6 = smov 64   ;;  %v1204_v21 = vmov 1966171168   ;;  %vm225_vm2 = vcmask 261120   ;;  %vm227_vm3 = vcmask 523264   ;;  %vm229_vm4 = vcmask 785408  }
   0x8   :  { %1132 = vmatprep.mubr.msk.f32.mxu0 %vm18_vm0, %v12_v14  ;;  %v234_v22 = vunpack.c.l.s4 %v1204_v21  ;;  %v1286_v25 = vshrl.u32 %v236_v23, 7  ;;  %v1205_v56 = vmov 0   ;;  %s1207_s0 = smov [#allocation2]  }
   0x9   :  { %s1022_s7 = sshll.u32 %s1207_s0, 4  ;;  %s1023_s7 = int_to_ptr.vmem [resolvable:$true] %s1022_s7 }
   0xa   :  { %v235_v24 = vunpack.c.0.s8 %v234_v22  ;;  %v283_v35 = vsub.s32 0, %v1286_v25  ;;  %vm340_vm5 = vcmp.lt.s32.totalorder %v1286_v25, 1  ;;  %vm341_vm6 = vcmp.lt.s32.totalorder %v1286_v25, 2  ;;  %s1177_s8 = scalar_lea.vmem %s1023_s7, 16  ;;  %s1181_s9 = scalar_lea.vmem %s1023_s7, 32 }
   0xb   :  { %vm342_vm10 = vcmp.lt.s32.totalorder %v1286_v25, 3  ;;  %vm343_vm15 = vcmp.lt.s32.totalorder %v1286_v25, 4  ;;  %p1178_p0 = scmp.ne.s32.totalorder %s1023_s7, %s1177_s8  ;;  %p1182_p1 = scmp.lt.s32.totalorder %s1023_s7, %s1023_s7 }
   0xc   :  { %v238_v27 = vsub.s32 %v235_v24, %v1286_v25  ;;  %p1183_p2 = scmp.lt.s32.totalorder %s1181_s9, %s1177_s8 }
   0xd   :  { %1169 = vmatpush3.bf16.xpose.msk.msra.mxu1 %vm1234_vm1, %v1164_v11 }
   0xe   :  { %1157 = vmatpush3.bf16.xpose.msk.msra.mxu0 %vm1234_vm1, %v1152_v12  ;;  %p1184_p3 = por %p1183_p2, %p1182_p1 }
  0x10   :  { %p1185_p4 = pnand %p1184_p3, %p1178_p0 }
  0x14   :  { %1144 = vmatmul.mubr.msk.f32.vlgmr.msra.gmra.mrb[0].mxu1 %vm18_vm0, %v1037_v15 }
  0x15   :  { %1133 = vmatmul.mubr.msk.f32.vlgmr.msra.gmra.mrb[0].mxu0 %vm18_vm0, %v13_v16 }
  0xe7   :  { %v1145_v17 = vpop.f32.mrb[0].mxu1 }
  0xe8   :  { %222 = vrot.lane.b32.xlu1 %v1145_v17, %s1201_s4  ;;  %v204_v18 = vpop.f32.mrb[1].mxu1  ;;  %v1134_v19 = vpop.f32.mrb[0].mxu0 }
  0xe9   :  { %214 = vrot.lane.b32.xlu0 %v204_v18, %s1202_s5  ;;  %v103_v20 = vpop.f32.mrb[1].mxu0 }
  0xed   :  { %218 = vrot.lane.b32.xlu0 %v1134_v19, %s1203_s6 }
 0x15a   :  { %v223_v30 = vpop.permute.xlu1 %222 }
 0x15b   :  { %v215_v26 = vpop.permute.xlu0 %214 }
 0x15c   :  { %v226_v28 = vsel %vm225_vm2, %v103_v20, %v215_v26  ;;  %vm344_vm2 = vcmp.lt.s32.totalorder %v1286_v25, 5 }
 0x15f   :  { %v219_v29 = vpop.permute.xlu0 %218 }
 0x160   :  { %v228_v31 = vsel %vm227_vm3, %v226_v28, %v219_v29 }
 0x161   :  { %v1289_v32 = vsel %vm229_vm4, %v228_v31, %v223_v30 }
 0x162   :  { %v232_v33 = vcombine.high %v1289_v32, %v1289_v32  ;;  %v239_v34 = vrot.slane %v1289_v32, %v238_v27  ;;  %v1387_v58 = vrot.slane %v1289_v32, 6  ;;  %v1395_v61 = vrot.slane %v1289_v32, 7 }
 0x164   :  { %v246_v36 = vrot.slane %v232_v33, %v238_v27  ;;  %v247_v37 = vcombine.high %v239_v34, %v239_v34  ;;  %v255_v38 = vrot.slane %v239_v34, %v238_v27 }
 0x166   :  { %v248_v39 = vcombine.high %v246_v36, %v246_v36  ;;  %v262_v40 = vrot.slane %v246_v36, %v238_v27  ;;  %v269_v41 = vrot.slane %v247_v37, %v238_v27  ;;  %v277_v42 = vcombine.high %v255_v38, %v255_v38 }
 0x167   :  { %v284_v43 = vrot.slane %v255_v38, %v283_v35 }
 0x168   :  { %v276_v44 = vrot.slane %v248_v39, %v238_v27  ;;  %v278_v45 = vcombine.high %v262_v40, %v262_v40  ;;  %v279_v46 = vcombine.high %v269_v41, %v269_v41  ;;  %v288_v47 = vrot.slane %v269_v41, %v283_v35 }
 0x169   :  { %v292_v48 = vrot.slane %v277_v42, %v283_v35  ;;  %v300_v49 = vrot.slane %v262_v40, %v283_v35  ;;  %vm323_vm7 = vcmp.lt.f32.partialorder %v1289_v32, %v284_v43 }
 0x16a   :  { %v280_v50 = vcombine.high %v276_v44, %v276_v44  ;;  %v296_v51 = vrot.slane %v279_v46, %v283_v35  ;;  %v304_v52 = vrot.slane %v276_v44, %v283_v35  ;;  %v308_v53 = vrot.slane %v278_v45, %v283_v35 }
 0x16b   :  { %vm324_vm8 = vcmp.lt.f32.partialorder %v1289_v32, %v288_v47  ;;  %vm332_vm9 = vcmp.eq.f32.partialorder %v1289_v32, %v288_v47  ;;  %vm333_vm12 = vcmp.eq.f32.partialorder %v1289_v32, %v292_v48  ;;  %vm335_vm14 = vcmp.eq.f32.partialorder %v1289_v32, %v300_v49 }
 0x16c   :  { %v312_v54 = vrot.slane %v280_v50, %v283_v35  ;;  %vm348_vm11 = vmand %vm332_vm9, %vm340_vm5  ;;  %vm334_vm13 = vcmp.eq.f32.partialorder %v1289_v32, %v296_v51  ;;  %vm336_vm1 = vcmp.eq.f32.partialorder %v1289_v32, %v304_v52  ;;  %v363_v57 = vsel %vm323_vm7, 1, %v1205_v56 }
 0x16d   :  { %vm356_vm0 = vmor %vm324_vm8, %vm348_vm11  ;;  %vm337_vm4 = vcmp.eq.f32.partialorder %v1289_v32, %v308_v53  ;;  %vm345_vm5 = vcmp.lt.s32.totalorder %v1286_v25, 6  ;;  %v371_v60 = vrot.slane %v363_v57, 4  ;;  %vm346_vm11 = vcmp.lt.s32.totalorder %v1286_v25, 7 }
 0x16e   :  { %vm1309_vm3 = vmand %vm333_vm12, %vm341_vm6  ;;  %v364_v59 = vsel %vm356_vm0, 1, %v1205_v56  ;;  %vm338_vm8 = vcmp.eq.f32.partialorder %v1289_v32, %v312_v54  ;;  %vm325_vm7 = vcmp.lt.f32.partialorder %v1289_v32, %v292_v48  ;;  %vm326_vm12 = vcmp.lt.f32.partialorder %v1289_v32, %v296_v51 }
 0x16f   :  { %vm1315_vm9 = vmand %vm334_vm13, %vm342_vm10  ;;  %v377_v62 = vrot.slane %v364_v59, 4  ;;  %v372_v2 = vadd.s32 %v371_v60, %v363_v57  ;;  %vm328_vm0 = vcmp.lt.f32.partialorder %v1289_v32, %v304_v52  ;;  %v1366_v50 = vrot.slane %v1289_v32, 1 }
 0x170   :  { %vm1323_vm6 = vmand %vm335_vm14, %vm343_vm15  ;;  %vm327_vm14 = vcmp.lt.f32.partialorder %v1289_v32, %v300_v49  ;;  %v1384_v57 = vrot.slane %v1289_v32, 5 }
 0x171   :  { %vm1330_vm10 = vmand %vm336_vm1, %vm344_vm2  ;;  %v378_v3 = vadd.s32 %v377_v62, %v364_v59  ;;  %vm329_vm2 = vcmp.lt.f32.partialorder %v1289_v32, %v308_v53  ;;  %v373_v8 = vrot.slane %v372_v2, 2  ;;  %v1373_v53 = vrot.slane %v1289_v32, 2 }
 0x172   :  { %vm1335_vm13 = vmand %vm337_vm4, %vm345_vm5  ;;  %vm330_vm5 = vcmp.lt.f32.partialorder %v1289_v32, %v312_v54  ;;  %v1376_v54 = vrot.slane %v1289_v32, 3  ;;  %v1206_v62 = vmov 0.0  }
 0x173   :  { %vm1340_vm15 = vmand %vm338_vm8, %vm346_vm11  ;;  %v379_v11 = vrot.slane %v378_v3, 2  ;;  %v374_v24 = vadd.s32 %v373_v8, %v372_v2 }
 0x174   :  { %vm357_vm1 = vmor %vm325_vm7, %vm1309_vm3 }
 0x175   :  { %vm358_vm4 = vmor %vm326_vm12, %vm1315_vm9  ;;  %v365_v4 = vsel %vm357_vm1, 1, %v1205_v56  ;;  %v380_v25 = vadd.s32 %v379_v11, %v378_v3  ;;  %v375_v37 = vrot.slane %v374_v24, 1 }
 0x176   :  { %vm359_vm8 = vmor %vm327_vm14, %vm1323_vm6  ;;  %v366_v5 = vsel %vm358_vm4, 1, %v1205_v56  ;;  %v383_v6 = vrot.slane %v365_v4, 4 }
 0x177   :  { %vm360_vm11 = vmor %vm328_vm0, %vm1330_vm10  ;;  %v367_v7 = vsel %vm359_vm8, 1, %v1205_v56  ;;  %v389_v9 = vrot.slane %v366_v5, 4  ;;  %v381_v38 = vrot.slane %v380_v25, 1  ;;  %v1359_v45 = vadd.s32 %v375_v37, %v374_v24 }
 0x178   :  { %vm361_vm3 = vmor %vm329_vm2, %vm1335_vm13  ;;  %v368_v10 = vsel %vm360_vm11, 1, %v1205_v56  ;;  %v384_v12 = vadd.s32 %v383_v6, %v365_v4  ;;  %v395_v13 = vrot.slane %v367_v7, 4 }
 0x179   :  { %vm362_vm9 = vmor %vm330_vm5, %vm1340_vm15  ;;  %v369_v14 = vsel %vm361_vm3, 1, %v1205_v56  ;;  %v390_v15 = vadd.s32 %v389_v9, %v366_v5  ;;  %v401_v16 = vrot.slane %v368_v10, 4  ;;  %v1361_v48 = vadd.s32 %v381_v38, %v380_v25 }
 0x17a   :  { %v370_v17 = vsel %vm362_vm9, 1, %v1205_v56  ;;  %v385_v18 = vrot.slane %v384_v12, 2  ;;  %v396_v19 = vadd.s32 %v395_v13, %v367_v7  ;;  %v407_v22 = vrot.slane %v369_v14, 4 }
 0x17b   :  { %v391_v20 = vrot.slane %v390_v15, 2  ;;  %v402_v21 = vadd.s32 %v401_v16, %v368_v10  ;;  %v413_v23 = vrot.slane %v370_v17, 4  ;;  %v1381_v56 = vrot.slane %v1289_v32, 4 }
 0x17c   :  { %v397_v26 = vrot.slane %v396_v19, 2  ;;  %v386_v27 = vadd.s32 %v385_v18, %v384_v12  ;;  %v408_v29 = vadd.s32 %v407_v22, %v369_v14  ;;  %vm419_vm6 = vcmp.eq.s32.totalorder %v1359_v45, 0 }
 0x17d   :  { %v403_v28 = vrot.slane %v402_v21, 2  ;;  %v414_v30 = vadd.s32 %v413_v23, %v370_v17  ;;  %v392_v31 = vadd.s32 %v391_v20, %v390_v15  ;;  %vm420_vm7 = vcmp.eq.s32.totalorder %v1361_v48, 0 }
 0x17e   :  { %v398_v33 = vadd.s32 %v397_v26, %v396_v19  ;;  %v409_v35 = vrot.slane %v408_v29, 2  ;;  %v387_v39 = vrot.slane %v386_v27, 1  ;;  %vm459_vm4 = vcmp.eq.s32.totalorder %v1359_v45, 5 }
 0x17f   :  { %v404_v34 = vadd.s32 %v403_v28, %v402_v21  ;;  %v415_v36 = vrot.slane %v414_v30, 2  ;;  %v393_v42 = vrot.slane %v392_v31, 1  ;;  %vm460_vm5 = vcmp.eq.s32.totalorder %v1361_v48, 5 }
 0x180   :  { %v410_v40 = vadd.s32 %v409_v35, %v408_v29  ;;  %v399_v43 = vrot.slane %v398_v33, 1  ;;  %v1363_v49 = vadd.s32 %v387_v39, %v386_v27  ;;  %v1447_v63 = vsel %vm419_vm6, 1.0, %v1206_v62 }
 0x181   :  { %v416_v41 = vadd.s32 %v415_v36, %v414_v30  ;;  %v405_v44 = vrot.slane %v404_v34, 1  ;;  %v1368_v51 = vadd.s32 %v393_v42, %v392_v31  ;;  %v1452_v0 = vsel %vm420_vm7, 1.0, %v1206_v62 }
 0x182   :  { %v411_v46 = vrot.slane %v410_v40, 1  ;;  %v1370_v52 = vadd.s32 %v399_v43, %v398_v33  ;;  %vm421_vm10 = vcmp.eq.s32.totalorder %v1363_v49, 0  ;;  %vm461_vm8 = vcmp.eq.s32.totalorder %v1363_v49, 5 }
 0x183   :  { %v417_v47 = vrot.slane %v416_v41, 1  ;;  %v1378_v55 = vadd.s32 %v405_v44, %v404_v34  ;;  %vm422_vm14 = vcmp.eq.s32.totalorder %v1368_v51, 0  ;;  %vm462_vm11 = vcmp.eq.s32.totalorder %v1368_v51, 5 }
 0x184   :  { %v1389_v59 = vadd.s32 %v411_v46, %v410_v40  ;;  %vm423_vm15 = vcmp.eq.s32.totalorder %v1370_v52, 0  ;;  %vm463_vm3 = vcmp.eq.s32.totalorder %v1370_v52, 5  ;;  %v1457_v1 = vsel %vm421_vm10, 1.0, %v1206_v62 }
 0x185   :  { %v1391_v60 = vadd.s32 %v417_v47, %v416_v41  ;;  %vm424_vm2 = vcmp.eq.s32.totalorder %v1378_v55, 0  ;;  %v1462_v2 = vsel %vm422_vm14, 1.0, %v1206_v62  ;;  %vm467_vm0 = vcmp.eq.s32.totalorder %v1359_v45, 6 }
 0x186   :  { %vm457_vm1 = vcmp.eq.s32.totalorder %v1389_v59, 4  ;;  %vm468_vm6 = vcmp.eq.s32.totalorder %v1361_v48, 6  ;;  %v1471_v3 = vsel %vm423_vm15, 1.0, %v1206_v62  ;;  %v1476_v4 = vsel %vm424_vm2, 1.0, %v1206_v62 }
 0x187   :  { %vm458_vm12 = vcmp.eq.s32.totalorder %v1391_v60, 4  ;;  %vm2212_vm7 = vcmp.eq.s32.totalorder %v1389_v59, 0  ;;  %vm2213_vm10 = vcmp.eq.s32.totalorder %v1391_v60, 0  ;;  %vm2214_vm2 = vcmp.eq.s32.totalorder %v1359_v45, 1 }
 0x188   :  { %v1481_v5 = vsel %vm2212_vm7, 1.0, %v1206_v62  ;;  %v1486_v6 = vsel %vm2213_vm10, 1.0, %v1206_v62  ;;  %v1495_v7 = vsel %vm2214_vm2, 1.0, %v1206_v62  ;;  %vm2215_vm7 = vcmp.eq.s32.totalorder %v1361_v48, 1 }
 0x189   :  { %v1500_v8 = vsel %vm2215_vm7, 1.0, %v1206_v62  ;;  %vm2216_vm10 = vcmp.eq.s32.totalorder %v1363_v49, 1  ;;  %vm2217_vm9 = vcmp.eq.s32.totalorder %v1368_v51, 1  ;;  %vm2218_vm7 = vcmp.eq.s32.totalorder %v1370_v52, 1 }
 0x18a   :  { %v1505_v9 = vsel %vm2216_vm10, 1.0, %v1206_v62  ;;  %v1510_v10 = vsel %vm2217_vm9, 1.0, %v1206_v62  ;;  %v1519_v11 = vsel %vm2218_vm7, 1.0, %v1206_v62  ;;  %vm2219_vm10 = vcmp.eq.s32.totalorder %v1378_v55, 1 }
 0x18b   :  { %v1524_v12 = vsel %vm2219_vm10, 1.0, %v1206_v62  ;;  %vm2220_vm9 = vcmp.eq.s32.totalorder %v1389_v59, 1  ;;  %vm2221_vm15 = vcmp.eq.s32.totalorder %v1391_v60, 1  ;;  %vm479_vm14 = vcmp.eq.s32.totalorder %v1370_v52, 7 }
 0x18c   :  { %v1529_v13 = vsel %vm2220_vm9, 1.0, %v1206_v62  ;;  %v1534_v14 = vsel %vm2221_vm15, 1.0, %v1206_v62  ;;  %vm480_vm7 = vcmp.eq.s32.totalorder %v1378_v55, 7  ;;  %vm2222_vm10 = vcmp.eq.s32.totalorder %v1359_v45, 2 }
 0x18d   :  { %v1543_v15 = vsel %vm2222_vm10, 1.0, %v1206_v62  ;;  %vm2223_vm9 = vcmp.eq.s32.totalorder %v1361_v48, 2  ;;  %vm2224_vm15 = vcmp.eq.s32.totalorder %v1363_v49, 2  ;;  %vm2225_vm2 = vcmp.eq.s32.totalorder %v1368_v51, 2 }
 0x18e   :  { %v1548_v16 = vsel %vm2223_vm9, 1.0, %v1206_v62  ;;  %v1553_v17 = vsel %vm2224_vm15, 1.0, %v1206_v62  ;;  %v1558_v18 = vsel %vm2225_vm2, 1.0, %v1206_v62  ;;  %vm2226_vm13 = vcmp.eq.s32.totalorder %v1370_v52, 2 }
 0x18f   :  { %v1563_v19 = vsel %vm2226_vm13, 1.0, %v1206_v62  ;;  %vm2227_vm10 = vcmp.eq.s32.totalorder %v1378_v55, 2  ;;  %vm2228_vm9 = vcmp.eq.s32.totalorder %v1389_v59, 2  ;;  %vm2229_vm15 = vcmp.eq.s32.totalorder %v1391_v60, 2 }
 0x190   :  { %v1568_v20 = vsel %vm2227_vm10, 1.0, %v1206_v62  ;;  %v1573_v21 = vsel %vm2228_vm9, 1.0, %v1206_v62  ;;  %v1578_v22 = vsel %vm2229_vm15, 1.0, %v1206_v62  ;;  %vm2230_vm2 = vcmp.eq.s32.totalorder %v1359_v45, 3 }
 0x191   :  { %v1583_v23 = vsel %vm2230_vm2, 1.0, %v1206_v62  ;;  %vm2231_vm13 = vcmp.eq.s32.totalorder %v1361_v48, 3  ;;  %vm2232_vm10 = vcmp.eq.s32.totalorder %v1363_v49, 3  ;;  %vm2233_vm9 = vcmp.eq.s32.totalorder %v1368_v51, 3 }
 0x192   :  { %v1588_v24 = vsel %vm2231_vm13, 1.0, %v1206_v62  ;;  %v1593_v25 = vsel %vm2232_vm10, 1.0, %v1206_v62  ;;  %v1598_v26 = vsel %vm2233_vm9, 1.0, %v1206_v62  ;;  %vm2234_vm15 = vcmp.eq.s32.totalorder %v1370_v52, 3 }
 0x193   :  { %v1603_v27 = vsel %vm2234_vm15, 1.0, %v1206_v62  ;;  %vm2235_vm2 = vcmp.eq.s32.totalorder %v1378_v55, 3  ;;  %vm2236_vm13 = vcmp.eq.s32.totalorder %v1389_v59, 3  ;;  %vm2237_vm10 = vcmp.eq.s32.totalorder %v1391_v60, 3 }
 0x194   :  { %v1608_v28 = vsel %vm2235_vm2, 1.0, %v1206_v62  ;;  %v1613_v29 = vsel %vm2236_vm13, 1.0, %v1206_v62  ;;  %v1618_v30 = vsel %vm2237_vm10, 1.0, %v1206_v62  ;;  %vm2238_vm9 = vcmp.eq.s32.totalorder %v1359_v45, 4 }
 0x195   :  { %v1623_v31 = vsel %vm2238_vm9, 1.0, %v1206_v62  ;;  %vm2239_vm15 = vcmp.eq.s32.totalorder %v1361_v48, 4  ;;  %vm2240_vm2 = vcmp.eq.s32.totalorder %v1363_v49, 4  ;;  %vm2241_vm13 = vcmp.eq.s32.totalorder %v1368_v51, 4 }
 0x196   :  { %v1628_v33 = vsel %vm2239_vm15, 1.0, %v1206_v62  ;;  %v1633_v34 = vsel %vm2240_vm2, 1.0, %v1206_v62  ;;  %v1638_v35 = vsel %vm2241_vm13, 1.0, %v1206_v62  ;;  %vm2242_vm10 = vcmp.eq.s32.totalorder %v1370_v52, 4 }
 0x197   :  { %v1643_v36 = vsel %vm2242_vm10, 1.0, %v1206_v62  ;;  %vm2243_vm9 = vcmp.eq.s32.totalorder %v1378_v55, 4  ;;  %v1653_v38 = vsel %vm457_vm1, 1.0, %v1206_v62  ;;  %v1658_v39 = vsel %vm458_vm12, 1.0, %v1206_v62 }
 0x198   :  { %v1648_v37 = vsel %vm2243_vm9, 1.0, %v1206_v62  ;;  %v1663_v40 = vsel %vm459_vm4, 1.0, %v1206_v62  ;;  %v1668_v41 = vsel %vm460_vm5, 1.0, %v1206_v62  ;;  %v1673_v42 = vsel %vm461_vm8, 1.0, %v1206_v62 }
 0x199   :  { %2244 = vst [vmem:[#allocation5_spill] sm:$0xff] %v1673_v42  ;;  %v1678_v43 = vsel %vm462_vm11, 1.0, %v1206_v62  ;;  %v1683_v44 = vsel %vm463_vm3, 1.0, %v1206_v62  ;;  %vm2247_vm12 = vcmp.eq.s32.totalorder %v1378_v55, 5  ;;  %vm2249_vm1 = vcmp.eq.s32.totalorder %v1389_v59, 5 }
 0x19a   :  { %2245 = vst [vmem:[#allocation6_spill] sm:$0xff] %v1678_v43  ;;  %2246 = vst [vmem:[#allocation7_spill] sm:$0xff] %v1683_v44  ;;  %v1688_v46 = vsel %vm2247_vm12, 1.0, %v1206_v62  ;;  %v1693_v47 = vsel %vm2249_vm1, 1.0, %v1206_v62  ;;  %vm2251_vm4 = vcmp.eq.s32.totalorder %v1391_v60, 5  ;;  %v1703_v43 = vsel %vm467_vm0, 1.0, %v1206_v62 }
 0x19b   :  { %2248 = vst [vmem:[#allocation8_spill] sm:$0xff] %v1688_v46  ;;  %2250 = vst [vmem:[#allocation9_spill] sm:$0xff] %v1693_v47  ;;  %v1698_v42 = vsel %vm2251_vm4, 1.0, %v1206_v62  ;;  %v1708_v44 = vsel %vm468_vm6, 1.0, %v1206_v62  ;;  %vm2255_vm5 = vcmp.eq.s32.totalorder %v1363_v49, 6  ;;  %vm2257_vm8 = vcmp.eq.s32.totalorder %v1368_v51, 6 }
 0x19c   :  { %2252 = vst [vmem:[#allocation10_spill] sm:$0xff] %v1698_v42  ;;  %2253 = vst [vmem:[#allocation11_spill] sm:$0xff] %v1703_v43  ;;  %v1713_v46 = vsel %vm2255_vm5, 1.0, %v1206_v62  ;;  %v1718_v47 = vsel %vm2257_vm8, 1.0, %v1206_v62  ;;  %vm2259_vm11 = vcmp.eq.s32.totalorder %v1370_v52, 6  ;;  %vm2261_vm0 = vcmp.eq.s32.totalorder %v1378_v55, 6 }
 0x19d   :  { %2254 = vst [vmem:[#allocation12_spill] sm:$0xff] %v1708_v44  ;;  %2256 = vst [vmem:[#allocation13_spill] sm:$0xff] %v1713_v46  ;;  %v1723_v42 = vsel %vm2259_vm11, 1.0, %v1206_v62  ;;  %v1728_v43 = vsel %vm2261_vm0, 1.0, %v1206_v62  ;;  %vm2263_vm3 = vcmp.eq.s32.totalorder %v1389_v59, 6  ;;  %vm2265_vm6 = vcmp.eq.s32.totalorder %v1391_v60, 6 }
 0x19e   :  { %2258 = vst [vmem:[#allocation14_spill] sm:$0xff] %v1718_v47  ;;  %2260 = vst [vmem:[#allocation15_spill] sm:$0xff] %v1723_v42  ;;  %v1733_v44 = vsel %vm2263_vm3, 1.0, %v1206_v62  ;;  %v1738_v46 = vsel %vm2265_vm6, 1.0, %v1206_v62  ;;  %vm2266_vm15 = vcmp.eq.s32.totalorder %v1359_v45, 7  ;;  %vm2267_vm2 = vcmp.eq.s32.totalorder %v1361_v48, 7 }
 0x19f   :  { %2262 = vst [vmem:[#allocation16_spill] sm:$0xff] %v1728_v43  ;;  %2264 = vst [vmem:[#allocation17_spill] sm:$0xff] %v1733_v44  ;;  %v1743_v47 = vsel %vm2266_vm15, 1.0, %v1206_v62  ;;  %v1748_v42 = vsel %vm2267_vm2, 1.0, %v1206_v62  ;;  %vm2268_vm13 = vcmp.eq.s32.totalorder %v1363_v49, 7  ;;  %vm2269_vm10 = vcmp.eq.s32.totalorder %v1368_v51, 7 }
 0x1a0   :  { %v1753_v43 = vsel %vm2268_vm13, 1.0, %v1206_v62  ;;  %v1758_v44 = vsel %vm2269_vm10, 1.0, %v1206_v62  ;;  %v1763_v45 = vsel %vm479_vm14, 1.0, %v1206_v62  ;;  %v1768_v48 = vsel %vm480_vm7, 1.0, %v1206_v62 }
 0x1a1   :  { %2270 = vst [vmem:[#allocation18_spill] sm:$0xff] %v1763_v45  ;;  %vm2271_vm9 = vcmp.eq.s32.totalorder %v1389_v59, 7  ;;  %vm2272_vm12 = vcmp.eq.s32.totalorder %v1391_v60, 7  ;;  %v1782_v52 = vmul.f32 %v1447_v63, %v1289_v32  ;;  %v1786_v45 = vmul.f32 %v1452_v0, %v1366_v50 }
 0x1a2   :  { %v1773_v49 = vsel %vm2271_vm9, 1.0, %v1206_v62  ;;  %v1778_v51 = vsel %vm2272_vm12, 1.0, %v1206_v62  ;;  %v1790_v55 = vmul.f32 %v1457_v1, %v1373_v53  ;;  %v1794_v59 = vmul.f32 %v1462_v2, %v1376_v54 }
 0x1a3   :  { %v1798_v60 = vmul.f32 %v1471_v3, %v1381_v56  ;;  %v1802_v62 = vmul.f32 %v1476_v4, %v1384_v57  ;;  %v1806_v63 = vmul.f32 %v1481_v5, %v1387_v58  ;;  %v1810_v0 = vmul.f32 %v1486_v6, %v1395_v61 }
 0x1a4   :  { %v1814_v1 = vmul.f32 %v1495_v7, %v1289_v32  ;;  %v1818_v2 = vmul.f32 %v1500_v8, %v1366_v50  ;;  %v1822_v3 = vmul.f32 %v1505_v9, %v1373_v53  ;;  %v1826_v4 = vmul.f32 %v1510_v10, %v1376_v54 }
 0x1a5   :  { %v1830_v5 = vmul.f32 %v1519_v11, %v1381_v56  ;;  %v1834_v6 = vmul.f32 %v1524_v12, %v1384_v57  ;;  %v1838_v7 = vmul.f32 %v1529_v13, %v1387_v58  ;;  %v1842_v8 = vmul.f32 %v1534_v14, %v1395_v61 }
 0x1a6   :  { %v1846_v9 = vmul.f32 %v1543_v15, %v1289_v32  ;;  %v1850_v10 = vmul.f32 %v1548_v16, %v1366_v50  ;;  %v1854_v11 = vmul.f32 %v1553_v17, %v1373_v53  ;;  %v1858_v12 = vmul.f32 %v1558_v18, %v1376_v54 }
 0x1a7   :  { %v1862_v13 = vmul.f32 %v1563_v19, %v1381_v56  ;;  %v1866_v14 = vmul.f32 %v1568_v20, %v1384_v57  ;;  %v1870_v15 = vmul.f32 %v1573_v21, %v1387_v58  ;;  %v1874_v16 = vmul.f32 %v1578_v22, %v1395_v61 }
 0x1a8   :  { %v1878_v17 = vmul.f32 %v1583_v23, %v1289_v32  ;;  %v1882_v18 = vmul.f32 %v1588_v24, %v1366_v50  ;;  %v1886_v19 = vmul.f32 %v1593_v25, %v1373_v53  ;;  %v1890_v20 = vmul.f32 %v1598_v26, %v1376_v54 }
 0x1a9   :  { %v1894_v21 = vmul.f32 %v1603_v27, %v1381_v56  ;;  %v1898_v22 = vmul.f32 %v1608_v28, %v1384_v57  ;;  %v1902_v23 = vmul.f32 %v1613_v29, %v1387_v58  ;;  %v1906_v24 = vmul.f32 %v1618_v30, %v1395_v61 }
 0x1aa   :  { %vm755_vm14 = vcmask 1041409   ;;  %v1910_v25 = vmul.f32 %v1623_v31, %v1289_v32  ;;  %v1914_v26 = vmul.f32 %v1628_v33, %v1366_v50  ;;  %v1918_v27 = vmul.f32 %v1633_v34, %v1373_v53 }
 0x1ab   :  { %v1922_v28 = vmul.f32 %v1638_v35, %v1376_v54  ;;  %vm758_vm7 = vcmask 1042434   ;;  %v1926_v29 = vmul.f32 %v1643_v36, %v1381_v56  ;;  %v1930_v30 = vmul.f32 %v1648_v37, %v1384_v57  ;;  %v2277_v36 = vld [vmem:[#allocation5_spill] sm:$0xff] }
 0x1ac   :  { %v1934_v31 = vmul.f32 %v1653_v38, %v1387_v58  ;;  %v1938_v33 = vmul.f32 %v1658_v39, %v1395_v61  ;;  %vm761_vm1 = vcmask 1043459   ;;  %v1942_v34 = vmul.f32 %v1663_v40, %v1289_v32  ;;  %v2279_v38 = vld [vmem:[#allocation6_spill] sm:$0xff]  ;;  %v2281_v39 = vld [vmem:[#allocation7_spill] sm:$0xff]  ;;  %v2283_v40 = vld [vmem:[#allocation8_spill] sm:$0xff] }
 0x1ad   :  { %v1946_v35 = vmul.f32 %v1668_v41, %v1366_v50  ;;  %v1950_v37 = vmul.f32 %v2277_v36, %v1373_v53  ;;  %vm764_vm4 = vcmask 1044484   ;;  %v2285_v41 = vld [vmem:[#allocation9_spill] sm:$0xff]  ;;  %v2287_v36 = vld [vmem:[#allocation10_spill] sm:$0xff]  ;;  %vm767_vm5 = vcmask 1045509  }
 0x1ae   :  { %2273 = vst [vmem:[#allocation19_spill] sm:$0xff] %v1934_v31  ;;  %2274 = vst [vmem:[#allocation20_spill] sm:$0xff] %v1938_v33  ;;  %v1954_v31 = vmul.f32 %v2279_v38, %v1376_v54  ;;  %v1958_v33 = vmul.f32 %v2281_v39, %v1381_v56  ;;  %v2289_v38 = vld [vmem:[#allocation11_spill] sm:$0xff]  ;;  %v2291_v39 = vld [vmem:[#allocation12_spill] sm:$0xff]  ;;  %vm770_vm8 = vcmask 1046534   ;;  %vm773_vm11 = vcmask 1047559  }
 0x1af   :  { %2275 = vst [vmem:[#allocation21_spill] sm:$0xff] %v1942_v34  ;;  %2276 = vst [vmem:[#allocation22_spill] sm:$0xff] %v1946_v35  ;;  %v1962_v34 = vmul.f32 %v2283_v40, %v1384_v57  ;;  %v1966_v35 = vmul.f32 %v2285_v41, %v1387_v58  ;;  %v2293_v40 = vld [vmem:[#allocation13_spill] sm:$0xff]  ;;  %v2294_v41 = vld [vmem:[#allocation14_spill] sm:$0xff] }
 0x1b0   :  { %2278 = vst [vmem:[#allocation5_spill] sm:$0xff] %v1950_v37  ;;  %2280 = vst [vmem:[#allocation6_spill] sm:$0xff] %v1954_v31  ;;  %v1970_v37 = vmul.f32 %v2287_v36, %v1395_v61  ;;  %v1974_v31 = vmul.f32 %v2289_v38, %v1289_v32  ;;  %v2295_v36 = vld [vmem:[#allocation15_spill] sm:$0xff]  ;;  %v2296_v38 = vld [vmem:[#allocation16_spill] sm:$0xff] }
 0x1b1   :  { %2282 = vst [vmem:[#allocation7_spill] sm:$0xff] %v1958_v33  ;;  %2284 = vst [vmem:[#allocation8_spill] sm:$0xff] %v1962_v34  ;;  %v1978_v33 = vmul.f32 %v2291_v39, %v1366_v50  ;;  %v1982_v34 = vmul.f32 %v2293_v40, %v1373_v53  ;;  %v2297_v39 = vld [vmem:[#allocation17_spill] sm:$0xff]  ;;  %v2002_v40 = vmul.f32 %v1738_v46, %v1395_v61  ;;  %v2299_v46 = vld [vmem:[#allocation18_spill] sm:$0xff] }
 0x1b2   :  { %2286 = vst [vmem:[#allocation9_spill] sm:$0xff] %v1966_v35  ;;  %2288 = vst [vmem:[#allocation10_spill] sm:$0xff] %v1970_v37  ;;  %v1986_v35 = vmul.f32 %v2294_v41, %v1376_v54  ;;  %v1990_v37 = vmul.f32 %v2295_v36, %v1381_v56  ;;  %v2006_v41 = vmul.f32 %v1743_v47, %v1289_v32  ;;  %v772_v47 = vrot.slane %v1810_v0, 1 }
 0x1b3   :  { %2290 = vst [vmem:[#allocation11_spill] sm:$0xff] %v1974_v31  ;;  %2292 = vst [vmem:[#allocation12_spill] sm:$0xff] %v1978_v33  ;;  %v1994_v31 = vmul.f32 %v2296_v38, %v1384_v57  ;;  %v1998_v33 = vmul.f32 %v2297_v39, %v1387_v58  ;;  %v2010_v36 = vmul.f32 %v1748_v42, %v1366_v50  ;;  %v754_v42 = vrot.slane %v1786_v45, 7 }
 0x1b4   :  { %2298 = vst [vmem:[#allocation13_spill] sm:$0xff] %v2002_v40  ;;  %v2014_v38 = vmul.f32 %v1753_v43, %v1373_v53  ;;  %v2018_v39 = vmul.f32 %v1758_v44, %v1376_v54  ;;  %v2022_v40 = vmul.f32 %v2299_v46, %v1381_v56  ;;  %v2026_v32 = vmul.f32 %v1768_v48, %v1384_v57 }
 0x1b5   :  { %v2030_v50 = vmul.f32 %v1773_v49, %v1387_v58  ;;  %v2034_v53 = vmul.f32 %v1778_v51, %v1395_v61  ;;  %v757_v54 = vrot.slane %v1790_v55, 6  ;;  %v760_v43 = vrot.slane %v1794_v59, 5 }
 0x1b6   :  { %v763_v56 = vrot.slane %v1798_v60, 4  ;;  %v766_v44 = vrot.slane %v1802_v62, 3  ;;  %v769_v57 = vrot.slane %v1806_v63, 2  ;;  %v775_v58 = vrot.slane %v1818_v2, 7 }
 0x1b7   :  { %v756_v61 = vsel %vm755_vm14, %v754_v42, %v1782_v52  ;;  %v777_v48 = vrot.slane %v1822_v3, 6  ;;  %v779_v45 = vrot.slane %v1826_v4, 5  ;;  %v781_v49 = vrot.slane %v1830_v5, 4 }
 0x1b8   :  { %v759_v51 = vsel %vm758_vm7, %v757_v54, %v756_v61  ;;  %v776_v55 = vsel %vm755_vm14, %v775_v58, %v1814_v1  ;;  %v783_v59 = vrot.slane %v1834_v6, 3  ;;  %v785_v60 = vrot.slane %v1838_v7, 2 }
 0x1b9   :  { %v762_v62 = vsel %vm761_vm1, %v760_v43, %v759_v51  ;;  %v778_v63 = vsel %vm758_vm7, %v777_v48, %v776_v55  ;;  %v787_v52 = vrot.slane %v1842_v8, 1  ;;  %v789_v0 = vrot.slane %v1850_v10, 7 }
 0x1ba   :  { %v765_v2 = vsel %vm764_vm4, %v763_v56, %v762_v62  ;;  %v780_v3 = vsel %vm761_vm1, %v779_v45, %v778_v63  ;;  %v791_v4 = vrot.slane %v1854_v11, 6  ;;  %v793_v1 = vrot.slane %v1858_v12, 5  ;;  %v2301_v63 = vld [vmem:[#allocation20_spill] sm:$0xff] }
 0x1bb   :  { %v768_v5 = vsel %vm767_vm5, %v766_v44, %v765_v2  ;;  %v782_v6 = vsel %vm764_vm4, %v781_v49, %v780_v3  ;;  %v790_v7 = vsel %vm755_vm14, %v789_v0, %v1846_v9  ;;  %v795_v46 = vrot.slane %v1862_v13, 4  ;;  %v2303_v2 = vld [vmem:[#allocation5_spill] sm:$0xff] }
 0x1bc   :  { %v771_v8 = vsel %vm770_vm8, %v769_v57, %v768_v5  ;;  %v784_v10 = vsel %vm767_vm5, %v783_v59, %v782_v6  ;;  %v792_v42 = vsel %vm758_vm7, %v791_v4, %v790_v7  ;;  %v797_v54 = vrot.slane %v1866_v14, 3  ;;  %v2304_v4 = vld [vmem:[#allocation6_spill] sm:$0xff]  ;;  %v2305_v5 = vld [vmem:[#allocation21_spill] sm:$0xff]  ;;  %v2306_v7 = vld [vmem:[#allocation7_spill] sm:$0xff] }
 0x1bd   :  { %v2072_v11 = vsel %vm773_vm11, %v772_v47, %v771_v8  ;;  %v786_v12 = vsel %vm770_vm8, %v785_v60, %v784_v10  ;;  %v794_v43 = vsel %vm761_vm1, %v793_v1, %v792_v42  ;;  %v799_v56 = vrot.slane %v1870_v15, 2  ;;  %v2300_v60 = vld [vmem:[#allocation19_spill] sm:$0xff]  ;;  %v2307_v42 = vld [vmem:[#allocation8_spill] sm:$0xff] }
 0x1be   :  { %v2078_v9 = vsel %vm773_vm11, %v787_v52, %v786_v12  ;;  %v796_v13 = vsel %vm764_vm4, %v795_v46, %v794_v43  ;;  %v801_v44 = vrot.slane %v1874_v16, 1  ;;  %v803_v57 = vrot.slane %v1882_v18, 7  ;;  %v2308_v12 = vld [vmem:[#allocation9_spill] sm:$0xff] }
 0x1bf   :  { %v798_v14 = vsel %vm767_vm5, %v797_v54, %v796_v13  ;;  %v805_v47 = vrot.slane %v1886_v19, 6  ;;  %v807_v58 = vrot.slane %v1890_v20, 5  ;;  %v809_v61 = vrot.slane %v1894_v21, 4 }
 0x1c0   :  { %v800_v48 = vsel %vm770_vm8, %v799_v56, %v798_v14  ;;  %v804_v15 = vsel %vm755_vm14, %v803_v57, %v1878_v17  ;;  %v811_v45 = vrot.slane %v1898_v22, 3  ;;  %v813_v49 = vrot.slane %v1902_v23, 2  ;;  %v2310_v14 = vld [vmem:[#allocation12_spill] sm:$0xff] }
 0x1c1   :  { %v2093_v16 = vsel %vm773_vm11, %v801_v44, %v800_v48  ;;  %v806_v18 = vsel %vm758_vm7, %v805_v47, %v804_v15  ;;  %v815_v19 = vrot.slane %v1906_v24, 1  ;;  %v817_v20 = vrot.slane %v1914_v26, 7  ;;  %v2309_v44 = vld [vmem:[#allocation10_spill] sm:$0xff] }
 0x1c2   :  { %v808_v21 = vsel %vm761_vm1, %v807_v58, %v806_v18  ;;  %v819_v51 = vrot.slane %v1918_v27, 6  ;;  %v821_v55 = vrot.slane %v1922_v28, 5  ;;  %v823_v17 = vrot.slane %v1926_v29, 4  ;;  %v2302_v27 = vld [vmem:[#allocation22_spill] sm:$0xff] }
 0x1c3   :  { %v810_v22 = vsel %vm764_vm4, %v809_v61, %v808_v21  ;;  %v818_v23 = vsel %vm755_vm14, %v817_v20, %v1910_v25  ;;  %v825_v59 = vrot.slane %v1930_v30, 3  ;;  %v827_v62 = vrot.slane %v2300_v60, 2 }
 0x1c4   :  { %v812_v24 = vsel %vm767_vm5, %v811_v45, %v810_v22  ;;  %v820_v26 = vsel %vm758_vm7, %v819_v51, %v818_v23  ;;  %v829_v52 = vrot.slane %v2301_v63, 1  ;;  %v831_v0 = vrot.slane %v2302_v27, 7 }
 0x1c5   :  { %v814_v28 = vsel %vm770_vm8, %v813_v49, %v812_v24  ;;  %v822_v29 = vsel %vm761_vm1, %v821_v55, %v820_v26  ;;  %v833_v3 = vrot.slane %v2303_v2, 6  ;;  %v835_v25 = vrot.slane %v2304_v4, 5  ;;  %v2311_v49 = vld [vmem:[#allocation11_spill] sm:$0xff] }
 0x1c6   :  { %v816_v30 = vsel %vm773_vm11, %v815_v19, %v814_v28  ;;  %v824_v1 = vsel %vm764_vm4, %v823_v17, %v822_v29  ;;  %v832_v6 = vsel %vm755_vm14, %v831_v0, %v2305_v5  ;;  %v837_v46 = vrot.slane %v2306_v7, 4  ;;  %v2312_v17 = vld [vmem:[#allocation13_spill] sm:$0xff] }
 0x1c7   :  { %v826_v8 = vsel %vm767_vm5, %v825_v59, %v824_v1  ;;  %v834_v10 = vsel %vm758_vm7, %v833_v3, %v832_v6  ;;  %v839_v54 = vrot.slane %v2307_v42, 3  ;;  %v841_v43 = vrot.slane %v2308_v12, 2 }
 0x1c8   :  { %v828_v56 = vsel %vm770_vm8, %v827_v62, %v826_v8  ;;  %v836_v13 = vsel %vm761_vm1, %v835_v25, %v834_v10  ;;  %v843_v57 = vrot.slane %v2309_v44, 1  ;;  %v845_v47 = vrot.slane %v2310_v14, 7 }
 0x1c9   :  { %v830_v58 = vsel %vm773_vm11, %v829_v52, %v828_v56  ;;  %v838_v61 = vsel %vm764_vm4, %v837_v46, %v836_v13  ;;  %v847_v48 = vrot.slane %v1982_v34, 6  ;;  %v849_v15 = vrot.slane %v1986_v35, 5 }
 0x1ca   :  { %v840_v45 = vsel %vm767_vm5, %v839_v54, %v838_v61  ;;  %v846_v18 = vsel %vm755_vm14, %v845_v47, %v2311_v49  ;;  %v851_v19 = vrot.slane %v1990_v37, 4  ;;  %v853_v20 = vrot.slane %v1994_v31, 3 }
 0x1cb   :  { %v842_v21 = vsel %vm770_vm8, %v841_v43, %v840_v45  ;;  %v848_v51 = vsel %vm758_vm7, %v847_v48, %v846_v18  ;;  %v855_v55 = vrot.slane %v1998_v33, 2  ;;  %v857_v22 = vrot.slane %v2312_v17, 1 }
 0x1cc   :  { %v844_v34 = vsel %vm773_vm11, %v843_v57, %v842_v21  ;;  %v850_v35 = vsel %vm761_vm1, %v849_v15, %v848_v51  ;;  %v859_v23 = vrot.slane %v2010_v36, 7  ;;  %v861_v59 = vrot.slane %v2014_v38, 6 }
 0x1cd   :  { %v852_v37 = vsel %vm764_vm4, %v851_v19, %v850_v35  ;;  %v863_v31 = vrot.slane %v2018_v39, 5  ;;  %v865_v60 = vrot.slane %v2022_v40, 4  ;;  %v867_v62 = vrot.slane %v2026_v32, 3 }
 0x1ce   :  { %v854_v33 = vsel %vm767_vm5, %v853_v20, %v852_v37  ;;  %v860_v24 = vsel %vm755_vm14, %v859_v23, %v2006_v41  ;;  %v869_v26 = vrot.slane %v2030_v50, 2  ;;  %v871_v63 = vrot.slane %v2034_v53, 1 }
 0x1cf   :  { %v856_v36 = vsel %vm770_vm8, %v855_v55, %v854_v33  ;;  %v862_v38 = vsel %vm758_vm7, %v861_v59, %v860_v24  ;;  %v881_v52 = vrot.slane %v2072_v11, 4  ;;  %v887_v39 = vrot.slane %v2078_v9, 4 }
 0x1d0   :  { %v858_v40 = vsel %vm773_vm11, %v857_v22, %v856_v36  ;;  %v864_v32 = vsel %vm761_vm1, %v863_v31, %v862_v38  ;;  %v893_v27 = vrot.slane %v2093_v16, 4  ;;  %v899_v0 = vrot.slane %v816_v30, 4 }
 0x1d1   :  { %v866_v41 = vsel %vm764_vm4, %v865_v60, %v864_v32  ;;  %v882_v50 = vadd.f32 %v881_v52, %v2072_v11  ;;  %v888_v53 = vadd.f32 %v887_v39, %v2078_v9  ;;  %v905_v28 = vrot.slane %v830_v58, 4 }
 0x1d2   :  { %v868_v29 = vsel %vm767_vm5, %v867_v62, %v866_v41  ;;  %v894_v2 = vadd.f32 %v893_v27, %v2093_v16  ;;  %v900_v3 = vadd.f32 %v899_v0, %v816_v30  ;;  %v911_v4 = vrot.slane %v844_v34, 4 }
 0x1d3   :  { %v870_v25 = vsel %vm770_vm8, %v869_v26, %v868_v29  ;;  %v883_v1 = vrot.slane %v882_v50, 2  ;;  %v889_v5 = vrot.slane %v888_v53, 2  ;;  %v906_v6 = vadd.f32 %v905_v28, %v830_v58 }
 0x1d4   :  { %v872_v7 = vsel %vm773_vm11, %v871_v63, %v870_v25  ;;  %v895_v46 = vrot.slane %v894_v2, 2  ;;  %v901_v8 = vrot.slane %v900_v3, 2  ;;  %v912_v10 = vadd.f32 %v911_v4, %v844_v34 }
 0x1d5   :  { %v884_v11 = vadd.f32 %v883_v1, %v882_v50  ;;  %v890_v42 = vadd.f32 %v889_v5, %v888_v53  ;;  %v907_v9 = vrot.slane %v906_v6, 2  ;;  %v917_v54 = vrot.slane %v858_v40, 4 }
 0x1d6   :  { %v896_v12 = vadd.f32 %v895_v46, %v894_v2  ;;  %v902_v43 = vadd.f32 %v901_v8, %v900_v3  ;;  %v913_v56 = vrot.slane %v912_v10, 2  ;;  %v923_v16 = vrot.slane %v872_v7, 4 }
 0x1d7   :  { %v885_v30 = vrot.slane %v884_v11, 1  ;;  %v891_v13 = vrot.slane %v890_v42, 1  ;;  %v908_v44 = vadd.f32 %v907_v9, %v906_v6  ;;  %v918_v57 = vadd.f32 %v917_v54, %v858_v40 }
 0x1d8   :  { %v897_v14 = vrot.slane %v896_v12, 1  ;;  %v903_v47 = vrot.slane %v902_v43, 1  ;;  %v914_v58 = vadd.f32 %v913_v56, %v912_v10  ;;  %v924_v61 = vadd.f32 %v923_v16, %v872_v7 }
 0x1d9   :  { %v892_v48 = vadd.f32 %v891_v13, %v890_v42  ;;  %v909_v15 = vrot.slane %v908_v44, 1  ;;  %v919_v45 = vrot.slane %v918_v57, 2  ;;  %v886_v21 = vadd.f32 %v885_v30, %v884_v11 }
 0x1da   :  { %v898_v49 = vadd.f32 %v897_v14, %v896_v12  ;;  %v904_v18 = vadd.f32 %v903_v47, %v902_v43  ;;  %v915_v19 = vrot.slane %v914_v58, 1  ;;  %v925_v20 = vrot.slane %v924_v61, 2 }
 0x1db   :  { %v910_v51 = vadd.f32 %v909_v15, %v908_v44  ;;  %v920_v55 = vadd.f32 %v919_v45, %v918_v57  ;;  %v937_v17 = vrot.slane %v892_v48, 7 }
 0x1dc   :  { %v916_v22 = vadd.f32 %v915_v19, %v914_v58  ;;  %v926_v34 = vadd.f32 %v925_v20, %v924_v61  ;;  %v939_v35 = vrot.slane %v898_v49, 6  ;;  %v941_v37 = vrot.slane %v904_v18, 5 }
 0x1dd   :  { %v921_v23 = vrot.slane %v920_v55, 1  ;;  %v938_v59 = vsel %vm755_vm14, %v937_v17, %v886_v21  ;;  %v943_v62 = vrot.slane %v910_v51, 4 }
 0x1de   :  { %v927_v31 = vrot.slane %v926_v34, 1  ;;  %v940_v60 = vsel %vm758_vm7, %v939_v35, %v938_v59  ;;  %v945_v26 = vrot.slane %v916_v22, 3 }
 0x1df   :  { %v922_v33 = vadd.f32 %v921_v23, %v920_v55  ;;  %v942_v24 = vsel %vm761_vm1, %v941_v37, %v940_v60 }
 0x1e0   :  { %v928_v63 = vadd.f32 %v927_v31, %v926_v34  ;;  %v944_v36 = vsel %vm764_vm4, %v943_v62, %v942_v24 }
 0x1e1   :  { %v946_v38 = vsel %vm767_vm5, %v945_v26, %v944_v36  ;;  %v947_v52 = vrot.slane %v922_v33, 2 }
 0x1e2   :  { %v949_v39 = vrot.slane %v928_v63, 1 }
 0x1e3   :  { %v948_v40 = vsel %vm770_vm8, %v947_v52, %v946_v38 }
 0x1e4   :  { %v950_v32 = vsel %vm773_vm11, %v949_v39, %v948_v40 }
 0x1e5   :  { %952 = vrot.lane.b32.xlu1 %v950_v32, %s1203_s6 }
 0x257   :  { %v953_v27 = vpop.permute.xlu1 %952 }
 0x258   :  { %v955_v0 = vrot.slane %v953_v27, 1  ;;  %v956_v41 = vrot.slane %v953_v27, 2  ;;  %v957_v50 = vrot.slane %v953_v27, 3  ;;  %v958_v53 = vrot.slane %v953_v27, 4 }
 0x259   :  { %v959_v28 = vrot.slane %v953_v27, 5  ;;  %v960_v29 = vrot.slane %v953_v27, 6  ;;  %v970_v2 = vsub.f32 %v886_v21, %v953_v27  ;;  %v961_v3 = vrot.slane %v953_v27, 7 }
 0x25a   :  { %v971_v4 = vsub.f32 %v892_v48, %v955_v0  ;;  %v972_v25 = vsub.f32 %v898_v49, %v956_v41  ;;  %v973_v1 = vsub.f32 %v904_v18, %v957_v50  ;;  %v974_v5 = vsub.f32 %v910_v51, %v958_v53 }
 0x25b   :  { %v975_v6 = vsub.f32 %v916_v22, %v959_v28  ;;  %v976_v7 = vsub.f32 %v922_v33, %v960_v29  ;;  %v977_v11 = vsub.f32 %v928_v63, %v961_v3  ;;  %v978_v9 = vmul.f32 %v970_v2, %v970_v2 }
 0x25c   :  { %v979_v46 = vmul.f32 %v971_v4, %v971_v4  ;;  %v980_v8 = vmul.f32 %v972_v25, %v972_v25  ;;  %v981_v10 = vmul.f32 %v973_v1, %v973_v1  ;;  %v982_v42 = vmul.f32 %v974_v5, %v974_v5 }
 0x25d   :  { %v983_v43 = vmul.f32 %v975_v6, %v975_v6  ;;  %v984_v56 = vmul.f32 %v976_v7, %v976_v7  ;;  %v985_v13 = vmul.f32 %v977_v11, %v977_v11 }
 0x25e   :  { %v994_v54 = vrot.slane %v979_v46, 7  ;;  %v996_v12 = vrot.slane %v980_v8, 6  ;;  %v998_v30 = vrot.slane %v981_v10, 5  ;;  %v1000_v57 = vrot.slane %v982_v42, 4 }
 0x25f   :  { %v1002_v47 = vrot.slane %v983_v43, 3  ;;  %v1004_v61 = vrot.slane %v984_v56, 2  ;;  %v1006_v15 = vrot.slane %v985_v13, 1 }
 0x260   :  { %v995_v16 = vsel %vm755_vm14, %v994_v54, %v978_v9 }
 0x261   :  { %v997_v44 = vsel %vm758_vm7, %v996_v12, %v995_v16 }
 0x262   :  { %v999_v14 = vsel %vm761_vm1, %v998_v30, %v997_v44 }
 0x263   :  { %v1001_v58 = vsel %vm764_vm4, %v1000_v57, %v999_v14 }
 0x264   :  { %v1003_v48 = vsel %vm767_vm5, %v1002_v47, %v1001_v58 }
 0x265   :  { %v1005_v45 = vsel %vm770_vm8, %v1004_v61, %v1003_v48 }
 0x266   :  { %v1007_v49 = vsel %vm773_vm11, %v1006_v15, %v1005_v45 }
 0x267   :  { %v1009_v18 = vrot.slane %v1007_v49, 4 }
 0x269   :  { %v1010_v19 = vadd.f32 %v1009_v18, %v1007_v49 }
 0x26b   :  { %v1011_v20 = vrot.slane %v1010_v19, 2 }
 0x26d   :  { %v1012_v21 = vadd.f32 %v1011_v20, %v1010_v19 }
 0x26f   :  { %v1013_v51 = vrot.slane %v1012_v21, 1 }
 0x271   :  { %v1014_v55 = vadd.f32 %v1013_v51, %v1012_v21 }
 0x273   :  { %1015 = vst [vmem:[#allocation2] sm:$0x1] %v1014_v55 }
 0x274   :  { %1188 = shalt.err (!%p1185_p4)
}
 0x275   :  { %s1189_s12 = scalar_lea.hbm %s2197_s2, 16 }
 0x276   :  { %p1190_p5 = scmp.ne.s32.totalorder %s2197_s2, %s1189_s12  ;;  %p1193_p6 = scmp.lt.u32.totalorder %s1189_s12, %s2197_s2 }
 0x278   :  { %p1195_p7 = pnand %p1193_p6, %p1190_p5 }
 0x27a   :  { %1198 = shalt.err (!%p1195_p7)
}
 0x27b   :  { %1025 = dma.vmem_to_hbm [thread:$0]  %s1023_s7, 16, %s2197_s2, [#allocation3]  }
 0x27c   :  { %1199 = dma.done.wait [#allocation3], 16  }
 0x27d   :  { %1200 = vsyncadd [#allocation3], 4294967280 }
 0x27e   :  { %1029 = vsyncpa [#allocation3], 1 }

</bundles_post_ra>
